<compile_context>
chip_gen: v7x
topology: tpu7x:2x2x1
jax: 0.10.0
libtpu: 0.0.40
codegen_flags: <defaults>
</compile_context>

<pallas_src>
import jax
import jax.numpy as jnp
from jax.experimental import pallas as pl
from jax.experimental.pallas import tpu as pltpu

T_NORM = 4.0           # T = lens = norm in the PyTorch module
INV_T = 1.0 / T_NORM   # folded into the conv weights (see _fold_bn_spike)
BN_EPS = 1e-5
_TARGET_BLOCK_BYTES = 2 * 1024 * 1024   # standalone spike kernel block size
_BASE = 8                               # aligned prefix of the spiked scratch


# ----------------------------------------------------------------------------
# 1) Standalone Multispike kernel (elementwise, HBM-bound)
# ----------------------------------------------------------------------------
def _multispike_kernel(x_ref, o_ref):
    x = x_ref[...].astype(jnp.float32)            # compute f32, I/O native dtype
    y = jnp.floor(jnp.clip(x, 0.0, T_NORM) + 0.5) * INV_T
    o_ref[...] = y.astype(o_ref.dtype)


def _multispike_2d(x2, tile_rows):
    rows, cols = x2.shape
    return pl.pallas_call(
        _multispike_kernel,
        out_shape=jax.ShapeDtypeStruct((rows, cols), x2.dtype),
        grid_spec=pltpu.PrefetchScalarGridSpec(
            num_scalar_prefetch=0,
            grid=(rows // tile_rows,),
            in_specs=[pl.BlockSpec((tile_rows, cols), lambda i: (i, 0))],
            out_specs=pl.BlockSpec((tile_rows, cols), lambda i: (i, 0)),
        ),
        compiler_params=pltpu.CompilerParams(dimension_semantics=("parallel",)),
    )(x2)


def _sublane_multiple(dtype):
    # 8 rows/vreg for 4-byte, 16 for 2-byte, 32 for 1-byte dtypes.
    return max(8, 32 // jnp.dtype(dtype).itemsize)


def _pick_tile_rows(rows, cols, dtype):
    """Largest legal tile height <= ~2 MiB that exactly divides `rows`."""
    itemsize = jnp.dtype(dtype).itemsize
    sub = _sublane_multiple(dtype)
    max_rows = max(sub, (_TARGET_BLOCK_BYTES // (itemsize * cols)) // sub * sub)
    if rows <= max_rows:
        # Whole array fits one block; use two blocks when cheap so the grid
        # axis can shard across v7x's 2 TensorCores.
        if rows >= 2 * sub and rows % (2 * sub) == 0:
            return rows // 2
        return rows
    if rows % sub != 0:
        return None
    for d in range(max_rows, sub - 1, -sub):
        if rows % d == 0:
            return d
    return sub


@jax.jit
def multispike(x):
    """Multispike forward: floor(clamp(x, 0, 4) + 0.5) / 4, native dtype I/O."""
    total = x.size
    for cols in (2048, 1024, 512, 256, 128):           # free (bitcast) reshape path
        if total % cols:
            continue
        rows = total // cols
        if rows < 8 and cols != 128:
            continue
        tile_rows = _pick_tile_rows(rows, cols, x.dtype)
        if tile_rows is None:
            continue
        y = _multispike_2d(x.reshape(rows, cols), tile_rows)
        return y.reshape(x.shape)

    # Rare fallback: element count with no factor of 128 -> one padding pass.
    # TODO(synk): mask the ragged tail in a final block instead of padding.
    lanes = 128
    sub = _sublane_multiple(x.dtype)
    rows = pl.cdiv(total, lanes)
    rows_p = ((rows + sub - 1) // sub) * sub
    flat = jnp.pad(jnp.ravel(x), (0, rows_p * lanes - total))
    tile_rows = _pick_tile_rows(rows_p, lanes, x.dtype)
    y = _multispike_2d(flat.reshape(rows_p, lanes), tile_rows)
    return y.reshape(-1)[:total].reshape(x.shape)


def multispike_ref(x):
    """Pure-JAX reference matching the PyTorch Multispike forward."""
    return jnp.floor(jnp.clip(x.astype(jnp.float32), 0.0, T_NORM) + 0.5) / T_NORM


# ----------------------------------------------------------------------------
# 2) Fused Multispike + 3x3 conv + folded BN (+ optional residual) kernel
# ----------------------------------------------------------------------------
def _row_pitch(w):
    """Per-image-row pitch inside the spiked scratch: >= W+2, multiple of 8."""
    return ((w + 2 + 7) // 8) * 8


def _pick_cout_tile(cout):
    if cout <= 256 or cout % 128 != 0:
        return cout
    for ct in (256, 128):
        if cout % ct == 0:
            return ct
    return cout


def _pick_row_block(h, w, ct):
    pitch = _row_pitch(w)
    max_m_rows = max(1, 512 // pitch)                          # MXU M dim ~<= 512
    max_acc_rows = max(1, (128 * 1024) // (4 * ct * pitch))    # f32 acc <= ~128 KiB
    cap = max(1, min(h, max_m_rows, max_acc_rows))
    for rb in range(cap, 0, -1):
        if h % rb == 0:
            return rb
    return 1


def _make_spike_conv_kernel(has_shortcut):
    """Kernel computing RB output rows x CT output channels per grid step.

    Scratch layout (2-D, f32): flat row index  _BASE + q*PITCH + u  holds the
    integer Multispike of input row (row0 + q - 1), column u (q in [0, RB+2),
    u in [0, W)).  Everything else stays zero, which provides the conv's
    1-pixel zero border (spike(0) == 0) with no jnp.pad HBM pass.  Each of the
    9 taps is then one contiguous (M, Cin) slice with M = RB*PITCH, so the MXU
    sees a tall LHS instead of one image row.
    """
    def kernel(*refs):
        if has_shortcut:
            x_ref, w_ref, b_ref, s_ref, o_ref, sp_ref = refs
        else:
            x_ref, w_ref, b_ref, o_ref, sp_ref = refs
            s_ref = None

        _, H, W, CIN = x_ref.shape
        _, RB, _, CT = o_ref.shape
        PITCH = _row_pitch(W)
        M = RB * PITCH

        r = pl.program_id(1)
        n_rb = pl.num_programs(1)
        row0 = r * RB

        def spiked(v):                      # (W, Cin) raw -> integer spike (f32)
            v = v.astype(jnp.float32)
            return jnp.floor(jnp.clip(v, 0.0, T_NORM) + 0.5).astype(sp_ref.dtype)

        # (Re)build the spiked scratch once per (sample, row block): spike is
        # computed once per element instead of once per tap.
        @pl.when(pl.program_id(2) == 0)
        def _fill():
            sp_ref[...] = jnp.zeros_like(sp_ref)            # zero border / slack
            for q in range(1, RB + 1):                      # always-valid body rows
                sp_ref[pl.ds(_BASE + q * PITCH, W), :] = spiked(x_ref[0, row0 + q - 1])

            @pl.when(r > 0)                                 # top halo row
            def _():
                sp_ref[pl.ds(_BASE, W), :] = spiked(x_ref[0, row0 - 1])

            @pl.when(r < n_rb - 1)                          # bottom halo row
            def _():
                sp_ref[pl.ds(_BASE + (RB + 1) * PITCH, W), :] = spiked(
                    x_ref[0, row0 + RB])

        acc = jnp.zeros((M, CT), jnp.float32)
        for t in range(9):
            dy, dx = divmod(t, 3)
            start = _BASE + dy * PITCH + dx - 1             # static offset
            # Cast-only per tap (the spike itself is precomputed); bf16 weights
            # + bf16 LHS drive the native MXU path with f32 accumulation.
            lhs = sp_ref[pl.ds(start, M), :].astype(w_ref.dtype)
            acc = acc + jnp.dot(lhs, w_ref[t], preferred_element_type=jnp.float32)
        acc = acc + b_ref[...].astype(jnp.float32)          # (1, CT) broadcast

        # Extract the W valid columns of every output row; fuse the residual.
        for h in range(RB):
            row = acc[h * PITCH:h * PITCH + W, :]
            if has_shortcut:
                row = row + s_ref[0, h].astype(jnp.float32)
            o_ref[0, h] = row.astype(o_ref.dtype)

    return kernel


def _spike_conv3x3_bn(x_nhwc, w_taps, b_row, shortcut=None):
    """y = conv3x3_bn(multispike(x)) (+ shortcut).  NHWC in / NHWC out.

    w_taps: (9, Cin, Cout) folded weights (BN scale and 1/T already applied),
            in the MXU dtype (bf16 or f32).  b_row: (1, Cout) f32 folded bias.
    """
    n, h, w, cin = x_nhwc.shape
    cout = w_taps.shape[-1]
    ct = _pick_cout_tile(cout)
    rb = _pick_row_block(h, w, ct)
    pitch = _row_pitch(w)
    scr_rows = _BASE + (rb + 2) * pitch + 8

    in_specs = [
        pl.BlockSpec((1, h, w, cin), lambda i, r, c: (i, 0, 0, 0)),   # resident sample
        pl.BlockSpec((9, cin, ct), lambda i, r, c: (0, 0, c)),        # Cout-tiled weights
        pl.BlockSpec((1, ct), lambda i, r, c: (0, c)),                # folded bias
    ]
    args = [x_nhwc, w_taps, b_row]
    if shortcut is not None:
        in_specs.append(pl.BlockSpec((1, rb, w, ct), lambda i, r, c: (i, r, 0, c)))
        args.append(shortcut)

    flops = 2 * n * h * w * 9 * cin * cout
    bytes_accessed = (
        x_nhwc.size * x_nhwc.dtype.itemsize
        + w_taps.size * w_taps.dtype.itemsize
        + b_row.size * b_row.dtype.itemsize
        + n * h * w * cout * x_nhwc.dtype.itemsize
        + (shortcut.size * shortcut.dtype.itemsize if shortcut is not None else 0))

    return pl.pallas_call(
        _make_spike_conv_kernel(shortcut is not None),
        out_shape=jax.ShapeDtypeStruct((n, h, w, cout), x_nhwc.dtype),
        grid_spec=pltpu.PrefetchScalarGridSpec(
            num_scalar_prefetch=0,
            grid=(n, h // rb, cout // ct),
            in_specs=in_specs,
            out_specs=pl.BlockSpec((1, rb, w, ct), lambda i, r, c: (i, r, 0, c)),
            scratch_shapes=[pltpu.VMEM((scr_rows, cin), jnp.float32)],
        ),
        compiler_params=pltpu.CompilerParams(
            dimension_semantics=("parallel", "parallel", "arbitrary")),
        cost_estimate=pl.CostEstimate(flops=flops, transcendentals=0,
                                      bytes_accessed=bytes_accessed),
    )(*args)


def _fold_bn_spike(w, b, gamma, beta, mean, var, eps=BN_EPS):
    """Fold inference BatchNorm2d AND the 1/T of Multispike into the conv.

    With s = floor(clamp(x,0,T)+0.5) (integer spike):
      BN(conv(s/T; W, b)) = conv(s; W*scale/T) + ((b - mean)*scale + beta)
    """
    scale = gamma / jnp.sqrt(var + eps)
    w_f = w * (scale * INV_T)[:, None, None, None]
    b_f = (b - mean) * scale + beta
    return w_f, b_f


def _taps(w):
    """(Cout, Cin, 3, 3) -> (9, Cin, Cout), tap index t = ky*3 + kx."""
    return jnp.transpose(w, (2, 3, 1, 0)).reshape(9, w.shape[1], w.shape[0])


def ms_conv_block_forward_nhwc(x_nhwc, params, *, mxu_dtype=jnp.bfloat16,
                               return_intermediate=False):
    """MS_ConvBlock forward, NHWC in / NHWC out (keep the network channels-last)."""
    w1, b1 = _fold_bn_spike(params["conv1_w"], params["conv1_b"], params["bn1_gamma"],
                            params["bn1_beta"], params["bn1_mean"], params["bn1_var"])
    w2, b2 = _fold_bn_spike(params["conv2_w"], params["conv2_b"], params["bn2_gamma"],
                            params["bn2_beta"], params["bn2_mean"], params["bn2_var"])
    w1t = _taps(w1).astype(mxu_dtype)
    w2t = _taps(w2).astype(mxu_dtype)
    b1r = b1[None, :].astype(jnp.float32)
    b2r = b2[None, :].astype(jnp.float32)

    h1 = _spike_conv3x3_bn(x_nhwc, w1t, b1r)                        # spike+conv1+bn1
    out = _spike_conv3x3_bn(h1, w2t, b2r, shortcut=x_nhwc)          # spike+conv2+bn2+res
    if return_intermediate:
        return out, h1
    return out


def ms_conv_block_forward(x, params, *, mxu_dtype=jnp.bfloat16,
                          return_intermediate=False):
    """NCHW convenience wrapper (PyTorch layout).

    For chained blocks convert to NHWC once at the network boundary and call
    ms_conv_block_forward_nhwc directly (avoids per-block transpose passes).
    """
    x_nhwc = jnp.transpose(x, (0, 2, 3, 1))
    res = ms_conv_block_forward_nhwc(x_nhwc, params, mxu_dtype=mxu_dtype,
                                     return_intermediate=return_intermediate)
    if return_intermediate:
        out, h1 = res
        return jnp.transpose(out, (0, 3, 1, 2)), jnp.transpose(h1, (0, 3, 1, 2))
    return jnp.transpose(res, (0, 3, 1, 2))


# ----------------------------------------------------------------------------
# Pure-JAX references
# ----------------------------------------------------------------------------
def conv3x3_bn_ref(x, w, b, gamma, beta, mean, var, eps=BN_EPS):
    y = jax.lax.conv_general_dilated(
        x, w, window_strides=(1, 1), padding=((1, 1), (1, 1)),
        dimension_numbers=("NCHW", "OIHW", "NCHW"))
    y = y + b[None, :, None, None]
    inv = (gamma / jnp.sqrt(var + eps))[None, :, None, None]
    return (y - mean[None, :, None, None]) * inv + beta[None, :, None, None]


def _spike_int(v):
    return jnp.floor(jnp.clip(v.astype(jnp.float32), 0.0, T_NORM) + 0.5)


def folded_conv_ref(x_nchw, w_folded, b_folded):
    """conv3x3(pad=1) of the integer spike with the folded weight/bias."""
    y = jax.lax.conv_general_dilated(
        _spike_int(x_nchw), w_folded.astype(jnp.float32), (1, 1), ((1, 1), (1, 1)),
        dimension_numbers=("NCHW", "OIHW", "NCHW"))
    return y + b_folded[None, :, None, None]


if __name__ == "__main__":
    key = jax.random.PRNGKey(0)
    ks = jax.random.split(key, 12)
    N, dim, H, W = 2, 4, 16, 16
    hidden = dim * 4                                   # mlp_ratio = 4

    x = jax.random.normal(ks[0], (N, dim, H, W), jnp.float32) * 3.0
    params = {
        "conv1_w": jax.random.normal(ks[1], (hidden, dim, 3, 3), jnp.float32) * 0.2,
        "conv1_b": jax.random.normal(ks[2], (hidden,), jnp.float32) * 0.1,
        "bn1_gamma": 1.0 + 0.1 * jax.random.normal(ks[3], (hidden,), jnp.float32),
        "bn1_beta": 0.1 * jax.random.normal(ks[4], (hidden,), jnp.float32),
        "bn1_mean": 0.1 * jax.random.normal(ks[5], (hidden,), jnp.float32),
        "bn1_var": jax.random.uniform(ks[6], (hidden,), jnp.float32, 0.5, 1.5),
        "conv2_w": jax.random.normal(ks[7], (dim, hidden, 3, 3), jnp.float32) * 0.2,
        "conv2_b": jax.random.normal(ks[8], (dim,), jnp.float32) * 0.1,
        "bn2_gamma": 1.0 + 0.1 * jax.random.normal(ks[9], (dim,), jnp.float32),
        "bn2_beta": 0.1 * jax.random.normal(ks[10], (dim,), jnp.float32),
        "bn2_mean": 0.1 * jax.random.normal(ks[11], (dim,), jnp.float32),
        "bn2_var": jax.random.uniform(ks[6], (dim,), jnp.float32, 0.5, 1.5),
    }

    # --- standalone Multispike kernel: f32 and bf16, native dtype I/O ---
    y = jax.block_until_ready(multispike(x))
    assert y.shape == x.shape and y.dtype == x.dtype
    assert jnp.allclose(y, multispike_ref(x), atol=1e-6), "multispike f32 mismatch"

    x_bf16 = x.astype(jnp.bfloat16)
    y_bf = jax.block_until_ready(multispike(x_bf16))
    assert y_bf.dtype == jnp.bfloat16
    assert jnp.allclose(y_bf.astype(jnp.float32),
                        multispike_ref(x_bf16).astype(jnp.float32),
                        atol=1e-6), "multispike bf16 mismatch"

    # --- full MS_ConvBlock forward (spike fused into each conv+BN kernel) ---
    fwd = jax.jit(ms_conv_block_forward,
                  static_argnames=("mxu_dtype", "return_intermediate"))

    w1f, b1f = _fold_bn_spike(params["conv1_w"], params["conv1_b"], params["bn1_gamma"],
                              params["bn1_beta"], params["bn1_mean"], params["bn1_var"])
    w2f, b2f = _fold_bn_spike(params["conv2_w"], params["conv2_b"], params["bn2_gamma"],
                              params["bn2_beta"], params["bn2_mean"], params["bn2_var"])
    h1_module = conv3x3_bn_ref(multispike_ref(x), params["conv1_w"], params["conv1_b"],
                               params["bn1_gamma"], params["bn1_beta"],
                               params["bn1_mean"], params["bn1_var"])

    for mxu_dtype, tol, module_tol in ((jnp.float32, 1e-4, 1e-4),
                                       (jnp.bfloat16, 1e-4, 5e-2)):
        out, h1 = fwd(x, params, mxu_dtype=mxu_dtype, return_intermediate=True)
        out = jax.block_until_ready(out)

        # Tight check of the kernel math against a reference using the SAME
        # folded (and, for bf16, identically quantized) weights.
        w1q = w1f.astype(mxu_dtype).astype(jnp.float32)
        w2q = w2f.astype(mxu_dtype).astype(jnp.float32)
        h1_ref = folded_conv_ref(x, w1q, b1f)
        assert jnp.allclose(h1, h1_ref, atol=tol, rtol=tol), \
            f"stage-1 mismatch ({mxu_dtype.__name__})"
        # Stage-2 reference is fed the verified Pallas h1 so the Multispike step
        # function sees bit-identical inputs on both sides.
        out_ref = folded_conv_ref(h1, w2q, b2f) + x
        assert out.shape == x.shape and out.dtype == x.dtype
        assert jnp.allclose(out, out_ref, atol=tol, rtol=tol), \
            f"block output mismatch ({mxu_dtype.__name__})"

        # Module-semantics check against the unfolded full-precision reference
        # (loose for bf16 weights, tight for the f32 configuration).
        assert jnp.allclose(h1, h1_module, atol=module_tol, rtol=module_tol), \
            f"module-semantics drift ({mxu_dtype.__name__})"

    print("KERNEL_OK")
</pallas_src>

<mosaic_0001>
module attributes {stable_mosaic.version = 11 : i64} {
  func.func @_multispike_kernel(%arg0: i32, %arg1: memref<8x256xf32, #tpu.memory_space<vmem>>, %arg2: memref<8x256xf32, #tpu.memory_space<vmem>>) attributes {dimension_semantics = [#tpu.dimension_semantics<parallel>], iteration_bounds = array<i64: 1>, scalar_prefetch = 0 : i64, scratch_operands = 0 : i64, tpu.core_type = #tpu.core_type<tc>, window_params = [{transform_indices = @transform_0, window_bounds = array<i64: 8, 256>}, {transform_indices = @transform_1, window_bounds = array<i64: 8, 256>}]} {
    %c0 = arith.constant 0 : index
    %c0_0 = arith.constant 0 : index
    %0 = vector.load %arg1[%c0, %c0_0] : memref<8x256xf32, #tpu.memory_space<vmem>>, vector<8x256xf32>
    %cst = arith.constant 0.000000e+00 : f32
    %cst_1 = arith.constant 4.000000e+00 : f32
    %1 = vector.broadcast %cst : f32 to vector<8x256xf32>
    %2 = arith.maximumf %1, %0 : vector<8x256xf32>
    %3 = vector.broadcast %cst_1 : f32 to vector<8x256xf32>
    %4 = arith.minimumf %3, %2 : vector<8x256xf32>
    %cst_2 = arith.constant 5.000000e-01 : f32
    %5 = vector.broadcast %cst_2 : f32 to vector<8x256xf32>
    %6 = arith.addf %4, %5 : vector<8x256xf32>
    %7 = math.floor %6 : vector<8x256xf32>
    %cst_3 = arith.constant 2.500000e-01 : f32
    %8 = vector.broadcast %cst_3 : f32 to vector<8x256xf32>
    %9 = arith.mulf %7, %8 : vector<8x256xf32>
    %c0_4 = arith.constant 0 : index
    %c0_5 = arith.constant 0 : index
    %10 = vector.load %arg2[%c0_4, %c0_5] : memref<8x256xf32, #tpu.memory_space<vmem>>, vector<8x256xf32>
    tpu.vector_store %arg2[%c0_4, %c0_5], %9 {strides = array<i32>} : memref<8x256xf32, #tpu.memory_space<vmem>>, vector<8x256xf32>,
    return
  }
  func.func @transform_0(%arg0: i32) -> (i32, i32) {
    %c0_i32 = arith.constant 0 : i32
    %c0_i32_0 = arith.constant 0 : i32
    return %arg0, %c0_i32 : i32, i32
  }
  func.func @transform_1(%arg0: i32) -> (i32, i32) {
    %c0_i32 = arith.constant 0 : i32
    %c0_i32_0 = arith.constant 0 : i32
    return %arg0, %c0_i32 : i32, i32
  }
}

</mosaic_0001>

<bundles_post_ra>
// kernel: multispike.1
= control target key start
LH: loop header
LB: loop body
LE: loop exit
PB: predicated region body
PF: predicated region fallthrough
CT: control target
= control target key end

     0   :  { %s48_s0 = inlined_call_operand.vmem [shape: f32[8,256], index: 0, kind: input, shape index: {}]   ;;  %s49_s1 = inlined_call_operand.vmem [shape: f32[8,256], index: 1, kind: output, shape index: {}]  }
   0x1   :  { %v8_v0 = vld [vmem:[%s48_s0] sm:$0xff]  ;;  %v9_v1 = vld [vmem:[%s48_s0 + $0x8] sm:$0xff] }
   0x2   :  { %v10_v2 = vmax.f32 %v8_v0, 0.0  ;;  %v11_v3 = vmax.f32 %v9_v1, 0.0 }
   0x4   :  { %v12_v4 = vmin.f32 %v10_v2, 4.0  ;;  %v13_v5 = vmin.f32 %v11_v3, 4.0 }
   0x6   :  { %v14_v6 = vadd.f32 0.5, %v12_v4  ;;  %v15_v7 = vadd.f32 0.5, %v13_v5 }
   0x8   :  { %v16_v8 = vfloor.f32 %v14_v6  ;;  %v17_v9 = vfloor.f32 %v15_v7 }
   0xa   :  { %v18_v10 = vmul.f32 0.25, %v16_v8  ;;  %v19_v11 = vmul.f32 0.25, %v17_v9 }
   0xc   :  { %20 = vst [vmem:[%s49_s1] sm:$0xff] %v18_v10  ;;  %21 = vst [vmem:[%s49_s1 + $0x8] sm:$0xff] %v19_v11 }

</bundles_post_ra>
